<compile_context>
chip_gen: v7x
topology: tpu7x:2x2x1
jax: 0.10.0
libtpu: 0.0.40
codegen_flags: <defaults>
</compile_context>

<pallas_src>
import functools

import jax
import jax.numpy as jnp
from jax.experimental import pallas as pl
from jax.experimental.pallas import tpu as pltpu

LANE = 128       # TPU vreg lane width (last dim)
SUBLANE = 8      # TPU vreg sublane count (f32, second-to-last dim)
_VMEM_BUDGET_BYTES = 16 * 1024 * 1024  # conservative across v5e / v6e / v7x


def _round_up(x, m):
    return ((x + m - 1) // m) * m


def _linear_kernel(x_ref, wt_ref, o_ref):
    # x_ref:  [TB, n_in]         current batch tile (pipelined)
    # wt_ref: [n_in, n_out_pad]  VMEM-resident across all grid steps
    # o_ref:  [TB, n_out_pad]    lane-dense output (n_out_pad % 128 == 0)
    o_ref[...] = jnp.dot(
        x_ref[...], wt_ref[...], preferred_element_type=jnp.float32
    )


def prepare_weight(weight):
    """One-time (init-time) conversion of PyTorch-layout weight [n_out, n_in]
    into a kernel-friendly, lane-padded [n_in, n_out_pad] operand.

    Doing this once hoists the transpose + padding out of every forward call.
    """
    n_out, n_in = weight.shape
    n_out_pad = _round_up(max(n_out, LANE), LANE)
    wt = jnp.zeros((n_in, n_out_pad), dtype=jnp.float32)
    wt = wt.at[:, :n_out].set(weight.T.astype(jnp.float32))
    return wt


def _pick_batch_tile(batch, n_in, n_out_pad, itemsize=4):
    # Large tiles amortize the ~0.35 us per-grid-step overhead (this kernel is
    # memory-bound for realistic LR sizes), capped against a conservative VMEM
    # budget that accounts for double-buffered x / out tiles plus the resident
    # weight tile.
    tb = min(_round_up(batch, SUBLANE), 2048)

    def vmem_bytes(t):
        return (2 * t * n_in + 2 * t * n_out_pad + n_in * n_out_pad) * itemsize

    while tb > SUBLANE and vmem_bytes(tb) > _VMEM_BUDGET_BYTES:
        tb //= 2
    return max(_round_up(tb, SUBLANE), SUBLANE)


@functools.partial(jax.jit, static_argnames=("n_out",))
def lr_forward(x, wt_padded, n_out):
    """Forward of LR: y = x @ weight.T (no bias).

    x:         [..., n_in]        float32 (leading dims are flattened to batch)
    wt_padded: [n_in, n_out_pad]  float32 (from prepare_weight)
    returns    [..., n_out]       float32
    """
    lead_shape = x.shape[:-1]
    n_in = x.shape[-1]
    x2 = x.reshape(-1, n_in)
    batch = x2.shape[0]

    n_in_w, n_out_pad = wt_padded.shape
    assert n_in == n_in_w
    assert n_out_pad % LANE == 0

    tb = _pick_batch_tile(batch, n_in, n_out_pad)
    batch_pad = _round_up(batch, tb)
    if batch_pad != batch:
        x2 = jnp.pad(x2, ((0, batch_pad - batch), (0, 0)))

    grid = (batch_pad // tb,)

    cost = pl.CostEstimate(
        flops=2 * batch_pad * n_in * n_out_pad,
        transcendentals=0,
        bytes_accessed=4 * (batch_pad * n_in + n_in * n_out_pad
                            + batch_pad * n_out_pad),
    )

    out_padded = pl.pallas_call(
        _linear_kernel,
        out_shape=jax.ShapeDtypeStruct((batch_pad, n_out_pad), jnp.float32),
        grid_spec=pltpu.PrefetchScalarGridSpec(
            num_scalar_prefetch=0,
            grid=grid,
            in_specs=[
                # batch tile i of x (pipelined: prefetch i+1 while computing i)
                pl.BlockSpec((tb, n_in), lambda i: (i, 0)),
                # weight: same block every step -> stays resident in VMEM
                pl.BlockSpec((n_in, n_out_pad), lambda i: (0, 0)),
            ],
            out_specs=pl.BlockSpec((tb, n_out_pad), lambda i: (i, 0)),
        ),
        compiler_params=pltpu.CompilerParams(
            # disjoint output tiles along batch; lets v7x shard across its 2 TCs
            dimension_semantics=("parallel",),
            vmem_limit_bytes=64 * 1024 * 1024,
        ),
        cost_estimate=cost,
    )(x2, wt_padded)

    # Wrapper-side slice back to the logical output shape (lane-dense inside
    # the kernel; layout plumbing only out here).
    y = out_padded[:batch, :n_out]
    return y.reshape(*lead_shape, n_out)


# TODO(synk): GradSampleModule's per-sample-gradient (backward) bookkeeping has
# no forward-pass equivalent; only the forward y = x @ W^T is implemented here.


if __name__ == "__main__":
    key = jax.random.PRNGKey(0)
    k_x, k_w = jax.random.split(key)

    batch, n_in, n_out = 8, 32, 16

    x = jax.random.normal(k_x, (batch, n_in), dtype=jnp.float32)
    # Deterministic init mimicking PyTorch Linear default: U(-1/sqrt(n_in), 1/sqrt(n_in))
    bound = 1.0 / (n_in ** 0.5)
    weight = jax.random.uniform(
        k_w, (n_out, n_in), minval=-bound, maxval=bound, dtype=jnp.float32
    )

    # One-time weight preparation (transpose + lane padding), as at module init.
    wt_padded = prepare_weight(weight)

    y = lr_forward(x, wt_padded, n_out)
    y = jax.block_until_ready(y)

    # Correctness check against plain JAX reference.
    y_ref = x @ weight.T
    assert y.shape == (batch, n_out)
    assert jnp.allclose(y, y_ref, atol=1e-5, rtol=1e-5)

    print("KERNEL_OK")
</pallas_src>

<mosaic_0001>
module attributes {stable_mosaic.version = 11 : i64} {
  func.func @_linear_kernel(%arg0: i32, %arg1: memref<8x32xf32, #tpu.memory_space<vmem>>, %arg2: memref<32x128xf32, #tpu.memory_space<vmem>>, %arg3: memref<8x128xf32, #tpu.memory_space<vmem>>) attributes {dimension_semantics = [#tpu.dimension_semantics<parallel>], iteration_bounds = array<i64: 1>, scalar_prefetch = 0 : i64, scratch_operands = 0 : i64, tpu.core_type = #tpu.core_type<tc>, window_params = [{transform_indices = @transform_0, window_bounds = array<i64: 8, 32>}, {pipeline_mode = #tpu.pipeline_mode<synchronous>, transform_indices = @transform_1, window_bounds = array<i64: 32, 128>}, {transform_indices = @transform_2, window_bounds = array<i64: 8, 128>}]} {
    %c0 = arith.constant 0 : index
    %c0_0 = arith.constant 0 : index
    %0 = vector.load %arg1[%c0, %c0_0] : memref<8x32xf32, #tpu.memory_space<vmem>>, vector<8x32xf32>
    %c0_1 = arith.constant 0 : index
    %c0_2 = arith.constant 0 : index
    %1 = vector.load %arg2[%c0_1, %c0_2] : memref<32x128xf32, #tpu.memory_space<vmem>>, vector<32x128xf32>
    %cst = arith.constant dense<0.000000e+00> : vector<8x128xf32>
    %2 = tpu.matmul %0, %1, %cst {dimension_numbers = #tpu.dot_dimension_numbers<[1], [0], [0], [1], [0, 0, 1, 1], [], []>} : vector<8x32xf32>, vector<32x128xf32>, vector<8x128xf32> -> vector<8x128xf32>
    %c0_3 = arith.constant 0 : index
    %c0_4 = arith.constant 0 : index
    %3 = vector.load %arg3[%c0_3, %c0_4] : memref<8x128xf32, #tpu.memory_space<vmem>>, vector<8x128xf32>
    tpu.vector_store %arg3[%c0_3, %c0_4], %2 {strides = array<i32>} : memref<8x128xf32, #tpu.memory_space<vmem>>, vector<8x128xf32>,
    return
  }
  func.func @transform_0(%arg0: i32) -> (i32, i32) {
    %c0_i32 = arith.constant 0 : i32
    %c0_i32_0 = arith.constant 0 : i32
    return %arg0, %c0_i32 : i32, i32
  }
  func.func @transform_1(%arg0: i32) -> (i32, i32) {
    %c0_i32 = arith.constant 0 : i32
    %c0_i32_0 = arith.constant 0 : i32
    %c0_i32_1 = arith.constant 0 : i32
    return %c0_i32, %c0_i32_0 : i32, i32
  }
  func.func @transform_2(%arg0: i32) -> (i32, i32) {
    %c0_i32 = arith.constant 0 : i32
    %c0_i32_0 = arith.constant 0 : i32
    return %arg0, %c0_i32 : i32, i32
  }
}

</mosaic_0001>

<bundles_post_ra>
// kernel: lr_forward.1
= control target key start
LH: loop header
LB: loop body
LE: loop exit
PB: predicated region body
PF: predicated region fallthrough
CT: control target
= control target key end

     0   :  { %7 = vsyncpa [#allocation3], 0  ;;  %s303_s0 = inlined_call_operand.hbm [shape: f32[8,32], index: 0, kind: input, shape index: {}]   ;;  %s304_s1 = inlined_call_operand.hbm [shape: f32[32,128], index: 1, kind: input, shape index: {}]   ;;  %s305_s2 = inlined_call_operand.hbm [shape: f32[8,128], index: 2, kind: output, shape index: {}]  }
   0x1   :  { %8 = vsyncpa [#allocation6], 0 }
   0x2   :  { %9 = vsyncpa [#allocation4], 0  ;;  %s237_s9 = smov [#allocation2]   ;;  %s238_s11 = smov [#allocation5]  }
   0x3   :  { %s16_s10 = sshll.u32 %s237_s9, 4  ;;  %s25_s12 = sshll.u32 %s238_s11, 4  ;;  %s17_s10 = int_to_ptr.vmem [resolvable:$true] %s16_s10  ;;  %s260_s12 = int_to_ptr.vmem [resolvable:$true] %s25_s12 }
   0x4   :  { %s165_s15 = scalar_lea.hbm %s303_s0, 128 }
   0x5   :  { %p166_p0 = scmp.ne.s32.totalorder %s303_s0, %s165_s15  ;;  %p169_p1 = scmp.lt.u32.totalorder %s165_s15, %s303_s0 }
   0x7   :  { %p171_p2 = pnand %p169_p1, %p166_p0 }
   0x9   :  { %174 = shalt.err (!%p171_p2)
}
   0xa   :  { %s175_s20 = scalar_lea.vmem %s17_s10, 128  ;;  %p180_p4 = scmp.lt.s32.totalorder %s17_s10, %s17_s10 }
   0xb   :  { %p176_p3 = scmp.ne.s32.totalorder %s17_s10, %s175_s20  ;;  %p181_p5 = scmp.lt.s32.totalorder %s175_s20, %s175_s20 }
   0xd   :  { %p182_p6 = por %p181_p5, %p180_p4 }
   0xf   :  { %p183_p7 = pnand %p182_p6, %p176_p3 }
  0x11   :  { %186 = shalt.err (!%p183_p7)
}
  0x12   :  { %19 = dma.hbm_to_vmem [thread:$0]  %s303_s0, 128, %s17_s10, [#allocation3]  }
  0x13   :  { %s187_s25 = scalar_lea.hbm %s304_s1, 512 }
  0x14   :  { %p188_p8 = scmp.ne.s32.totalorder %s304_s1, %s187_s25  ;;  %p191_p9 = scmp.lt.u32.totalorder %s187_s25, %s304_s1 }
  0x16   :  { %p193_p10 = pnand %p191_p9, %p188_p8 }
  0x18   :  { %196 = shalt.err (!%p193_p10)
}
  0x19   :  { %s197_s30 = scalar_lea.vmem %s260_s12, 512  ;;  %p202_p12 = scmp.lt.s32.totalorder %s260_s12, %s260_s12 }
  0x1a   :  { %p198_p11 = scmp.ne.s32.totalorder %s260_s12, %s197_s30  ;;  %p203_p13 = scmp.lt.s32.totalorder %s197_s30, %s197_s30 }
  0x1c   :  { %p204_p0 = por %p203_p13, %p202_p12 }
  0x1e   :  { %p205_p1 = pnand %p204_p0, %p198_p11 }
  0x20   :  { %208 = shalt.err (!%p205_p1)
}
  0x21   :  { %s239_s0 = smov 128   ;;  %s240_s3 = smov 8  }
  0x22   :  { %31 = dma.hbm_to_vmem [thread:$0]  %s304_s1, 512, %s260_s12, [#allocation6], %s239_s0, %s239_s0, %s240_s3  }
  0x23   :  { %231 = dma.done.wait [#allocation3], 128  }
  0x24   :  { %232 = vsyncadd [#allocation3], 4294967168 }
  0x25   :  { %233 = dma.done.wait [#allocation6], 512  }
  0x26   :  { %234 = vsyncadd [#allocation6], 4294966784  ;;  %v241_v0 = vmov 0.0|0.0   ;;  %vm242_vm0 = vmmov 0   ;;  %v243_v1 = vmov 0.0   ;;  %v39_v2 = vld [vmem:[#allocation5] sm:$0xff] }
  0x27   :  { %151 = vmatprep.subr.bf16.mxu0 %v241_v0  ;;  %148 = vmatprep.mubr.msk.f32.mxu0 %vm242_vm0, %v243_v1  ;;  %v40_v3 = vld [vmem:[#allocation5 + $0x8] sm:$0xff]  ;;  %v41_v4 = vld [vmem:[#allocation5 + $0x10] sm:$0xff]  ;;  %v42_v6 = vld [vmem:[#allocation5 + $0x18] sm:$0xff]  ;;  %vm43_vm1 = vcmask 261120   ;;  %s244_s1 = smov [#allocation7]  }
  0x28   :  { %v152_v5 = vpack.c.bf16 %v40_v3, %v39_v2  ;;  %v155_v7 = vpack.c.bf16 %v42_v6, %v41_v4  ;;  %v38_v8 = vld [vmem:[#allocation2] sm:$0xff]  ;;  %s124_s6 = sshll.u32 %s244_s1, 4  ;;  %s125_s6 = int_to_ptr.vmem [resolvable:$true] %s124_s6 }
  0x29   :  { %s209_s7 = scalar_lea.vmem %s125_s6, 128  ;;  %p214_p3 = scmp.lt.s32.totalorder %s125_s6, %s125_s6 }
  0x2a   :  { %153 = vmatpush3.bf16.msra.mxu0 %v152_v5  ;;  %p210_p2 = scmp.ne.s32.totalorder %s125_s6, %s209_s7  ;;  %p215_p4 = scmp.lt.s32.totalorder %s209_s7, %s209_s7 }
  0x2b   :  { %154 = vmatprep.subr.bf16.mxu0 %v241_v0 }
  0x2c   :  { %p216_p5 = por %p215_p4, %p214_p3 }
  0x2e   :  { %156 = vmatpush3.bf16.msra.mxu0 %v155_v7  ;;  %p217_p6 = pnand %p216_p5, %p210_p2 }
  0x31   :  { %149 = vmatmul.mubr.msk.f32.vlgmr.msra.gmra.mrb[0].mxu0 %vm43_vm1, %v38_v8 }
 0x104   :  { %v113_v9 = vpop.f32.mrb[0].mxu0 }
 0x105   :  { %117 = vst [vmem:[#allocation7] sm:$0xff] %v113_v9  ;;  %v150_v10 = vpop.f32.mrb[1].mxu0 }
 0x106   :  { %220 = shalt.err (!%p217_p6)
}
 0x107   :  { %s221_s10 = scalar_lea.hbm %s305_s2, 128 }
 0x108   :  { %p222_p7 = scmp.ne.s32.totalorder %s305_s2, %s221_s10  ;;  %p225_p8 = scmp.lt.u32.totalorder %s221_s10, %s305_s2 }
 0x10a   :  { %p227_p9 = pnand %p225_p8, %p222_p7 }
 0x10c   :  { %230 = shalt.err (!%p227_p9)
}
 0x10d   :  { %127 = dma.vmem_to_hbm [thread:$0]  %s125_s6, 128, %s305_s2, [#allocation4]  }
 0x10e   :  { %235 = dma.done.wait [#allocation4], 128  }
 0x10f   :  { %236 = vsyncadd [#allocation4], 4294967168 }
 0x110   :  { %131 = vsyncpa [#allocation3], 1 }
 0x111   :  { %132 = vsyncpa [#allocation6], 1 }
 0x112   :  { %133 = vsyncpa [#allocation4], 1 }

</bundles_post_ra>
